<compile_context>
chip_gen: v7x
topology: tpu7x:2x2x1
jax: 0.10.0
libtpu: 0.0.40
codegen_flags: <defaults>
</compile_context>

<pallas_src>
import functools

import jax
import jax.numpy as jnp
from jax.experimental import pallas as pl
from jax.experimental.pallas import tpu as pltpu


def _round_up(n, m):
    return ((n + m - 1) // m) * m


def _self_attention_kernel(x_ref, w_ref, b_ref, o_ref, *,
                           bblk, seq_len, emb_dim, emb_pad, lane_dense_out):
    """One grid step handles `bblk` batch elements.

    x_ref : (bblk*seq_len, emb_dim)       flattened rows of this batch block
    w_ref : (emb_dim, 3*emb_pad)          fused, scale-folded [Wq | Wk | Wv]
    b_ref : (1, 3*emb_pad)                fused [bq | bk | bv]
    o_ref : (bblk, 1, seq_len*emb_dim)    if lane_dense_out
            (bblk, seq_len, emb_dim)      otherwise
    """
    # Fused Q/K/V projection: one big MXU matmul over every row of the block.
    # The 1/sqrt(E) scale is already folded into the q-columns of w/b (in f32),
    # so q needs no rescale here.
    qkv = jnp.dot(x_ref[...], w_ref[...],
                  preferred_element_type=jnp.float32) + b_ref[...]
    qkv = qkv.astype(x_ref.dtype)                        # bf16 MXU path if x is bf16
    qkv = qkv.reshape(bblk, seq_len, 3 * emb_pad)

    # 128-lane-aligned views of q / k / v (emb_pad is a multiple of 128 or == E).
    q = qkv[:, :, 0:emb_pad]
    k = qkv[:, :, emb_pad:2 * emb_pad]
    v = qkv[:, :, 2 * emb_pad:3 * emb_pad]

    # Batched scores for the whole block: one MXU contraction, no explicit k.T.
    scores = jnp.einsum("bqe,bke->bqk", q, k,
                        preferred_element_type=jnp.float32)    # (bblk, S, S) f32

    # Numerically-stable softmax in f32; denominator reciprocal on the EUP.
    scores = scores - jnp.max(scores, axis=-1, keepdims=True)
    p = jnp.exp(scores)
    attn = p * pl.reciprocal(jnp.sum(p, axis=-1, keepdims=True), approx=True)

    out = jnp.einsum("bqk,bke->bqe", attn.astype(v.dtype), v,
                     preferred_element_type=jnp.float32)       # (bblk, S, emb_pad)
    out = out[:, :, 0:emb_dim].astype(o_ref.dtype)             # drop lane padding

    if lane_dense_out:
        # E % 128 != 0: store one lane-dense (1, S*E) slab per batch element
        # (unmasked vst) instead of E(<128)-wide masked partial stores.
        o_ref[...] = out.reshape(bblk, 1, seq_len * emb_dim)
    else:
        o_ref[...] = out

    # TODO(synk): the optional `mask` argument of the PyTorch forward is not
    # wired in (mask=None path only); it would arrive as an additive (S, S)
    # bias applied to `scores` before the softmax.
    # TODO(synk): for large S (>~1k on v7x, >~2k on v6e) switch to a
    # query-tiled online-softmax (flash-style) grid so the (S, S) f32 scores
    # slab never has to live in VMEM.


def _pick_batch_block(batch, seq_len, emb_dim, emb_pad,
                      *, vmem_budget_bytes=12 << 20):
    """Choose how many batch elements each grid step processes.

    Priorities:
      1. the x block (bblk*S, E) must be layout-legal (sublane count % 8 == 0,
         or the block covers the whole array),
      2. per-step live activation bytes stay under a VMEM budget (never fall
         back to the whole batch just because it divides evenly),
      3. keep grid extent >= 2 when possible (pipeline overlap + v7x megacore),
      4. otherwise make the block as large as possible (amortizes the ~0.35us
         per-grid-step overhead and fills MXU rows / sublanes).
    """
    def rows_ok(c):
        rows = c * seq_len
        return rows % 8 == 0 or c == batch

    def live_bytes(c):
        rows = c * seq_len
        return (rows * emb_dim * 4                 # x block (f32 upper bound)
                + rows * 3 * emb_pad * 4           # qkv (f32 accumulate)
                + 2 * c * seq_len * seq_len * 4    # scores + probs (f32)
                + rows * emb_pad * 4)              # attn @ v (f32)

    legal = [c for c in range(1, batch + 1) if batch % c == 0 and rows_ok(c)]
    if not legal:
        legal = [batch]                            # full array is always legal
    fitting = [c for c in legal if live_bytes(c) <= vmem_budget_bytes]
    pool = fitting if fitting else [min(legal)]    # nothing fits -> smallest legal
    multi = [c for c in pool if batch // c >= 2]   # prefer >= 2 grid steps
    pool = multi if multi else pool
    return max(pool)


def self_attention_block(x, wq, wk, wv, bq, bk, bv):
    """x: (B, S, E); w*: (E, E) pre-transposed (in, out); b*: (1, E)."""
    B, S, E = x.shape
    scale = 1.0 / (E ** 0.5)

    # Lane-pad each projection's output columns to a multiple of 128 so the
    # in-kernel q/k/v splits of the fused qkv tensor are tile-aligned views.
    Ep = E if E % 128 == 0 else _round_up(E, 128)

    def pad_cols(a):
        return a if Ep == E else jnp.pad(a, ((0, 0), (0, Ep - E)))

    # Host-side fusion of the three projections; the 1/sqrt(E) score scale is
    # folded into the f32 q weights/bias so the kernel never rescales q.
    w_qkv = jnp.concatenate(
        [pad_cols(wq * scale), pad_cols(wk), pad_cols(wv)], axis=1)  # (E, 3*Ep)
    b_qkv = jnp.concatenate(
        [pad_cols(bq * scale), pad_cols(bk), pad_cols(bv)], axis=1)  # (1, 3*Ep)

    bblk = _pick_batch_block(B, S, E, Ep)
    grid = (B // bblk,)

    # Flatten (B, S) so the projection input is one 2D slab: each grid step's
    # matmul sees bblk*S rows (better MXU / sublane fill than per-sequence steps).
    x2d = x.reshape(B * S, E)

    # E < 128: lane-dense (1, S*E) output slab per batch element; otherwise the
    # natural (S, E) layout is already lane-dense.
    lane_dense_out = (E % 128 != 0)
    if lane_dense_out:
        out_shape = jax.ShapeDtypeStruct((B, 1, S * E), x.dtype)
        out_spec = pl.BlockSpec((bblk, 1, S * E), lambda i: (i, 0, 0))
    else:
        out_shape = jax.ShapeDtypeStruct((B, S, E), x.dtype)
        out_spec = pl.BlockSpec((bblk, S, E), lambda i: (i, 0, 0))

    kernel = functools.partial(
        _self_attention_kernel,
        bblk=bblk, seq_len=S, emb_dim=E, emb_pad=Ep,
        lane_dense_out=lane_dense_out)

    itemsize = jnp.dtype(x.dtype).itemsize
    cost = pl.CostEstimate(
        flops=2 * B * S * E * 3 * Ep + 4 * B * S * S * Ep,
        transcendentals=B * S * S,
        bytes_accessed=(x.size * itemsize
                        + w_qkv.size * w_qkv.dtype.itemsize
                        + b_qkv.size * b_qkv.dtype.itemsize
                        + B * S * E * itemsize))

    out = pl.pallas_call(
        kernel,
        out_shape=out_shape,
        grid=grid,
        in_specs=[
            # x rows of this batch block (pipelined / double-buffered).
            pl.BlockSpec((bblk * S, E), lambda i: (i, 0)),
            # Grid-invariant fused weight / bias: single-buffered so a large
            # fused weight is not held twice in VMEM (v7x has only 64 MiB).
            pl.BlockSpec((E, 3 * Ep), lambda i: (0, 0),
                         pipeline_mode=pl.Buffered(1)),
            pl.BlockSpec((1, 3 * Ep), lambda i: (0, 0),
                         pipeline_mode=pl.Buffered(1)),
        ],
        out_specs=out_spec,
        compiler_params=pltpu.CompilerParams(
            dimension_semantics=("parallel",),        # megacore split on v7x
            vmem_limit_bytes=48 * 1024 * 1024),
        cost_estimate=cost,
    )(x2d, w_qkv, b_qkv)

    return out.reshape(B, S, E) if lane_dense_out else out


def _reference(x, wq, wk, wv, bq, bk, bv):
    """Pure-JAX reference matching the PyTorch module forward (mask=None)."""
    E = x.shape[-1]
    q = x @ wq + bq
    k = x @ wk + bk
    v = x @ wv + bv
    scores = jnp.einsum("bqe,bke->bqk", q, k) / (E ** 0.5)
    w = jax.nn.softmax(scores, axis=-1)
    return jnp.einsum("bqk,bke->bqe", w, v)


def _init_linear_params(key, embedding_dim):
    """Deterministic PyTorch-style init: U(-1/sqrt(in), 1/sqrt(in)) for W and b."""
    kw, kb = jax.random.split(key)
    bound = 1.0 / (embedding_dim ** 0.5)
    # weight stored already transposed to (in, out)
    w = jax.random.uniform(kw, (embedding_dim, embedding_dim),
                           jnp.float32, -bound, bound)
    b = jax.random.uniform(kb, (1, embedding_dim), jnp.float32, -bound, bound)
    return w, b


if __name__ == "__main__":
    B, S, E = 2, 8, 32  # batch, sequence_length, embedding_dim

    root = jax.random.PRNGKey(0)
    kx, kv, kq, kk = jax.random.split(root, 4)

    x = jax.random.normal(kx, (B, S, E), jnp.float32)
    wv, bv = _init_linear_params(kv, E)
    wq, bq = _init_linear_params(kq, E)
    wk, bk = _init_linear_params(kk, E)

    out = self_attention_block(x, wq, wk, wv, bq, bk, bv)
    out = jax.block_until_ready(out)

    ref = _reference(x, wq, wk, wv, bq, bk, bv)
    assert out.shape == (B, S, E)
    # Tolerance is slightly loosened vs exact f32 because the softmax
    # denominator uses the EUP approximate reciprocal (pl.reciprocal approx=True).
    assert jnp.allclose(out, ref, rtol=5e-3, atol=1e-3), "mismatch vs reference"

    print("KERNEL_OK")
</pallas_src>

<mosaic_0001>
module attributes {stable_mosaic.version = 11 : i64} {
  func.func @_self_attention_kernel(%arg0: i32, %arg1: memref<8x32xf32, #tpu.memory_space<vmem>>, %arg2: memref<32x384xf32, #tpu.memory_space<vmem>>, %arg3: memref<1x384xf32, #tpu.memory_space<vmem>>, %arg4: memref<1x1x256xf32, #tpu.memory_space<vmem>>) attributes {dimension_semantics = [#tpu.dimension_semantics<parallel>], iteration_bounds = array<i64: 2>, scalar_prefetch = 0 : i64, scratch_operands = 0 : i64, tpu.core_type = #tpu.core_type<tc>, window_params = [{transform_indices = @transform_0, window_bounds = array<i64: 8, 32>}, {pipeline_mode = #tpu.pipeline_mode<synchronous>, transform_indices = @transform_1, window_bounds = array<i64: 32, 384>}, {pipeline_mode = #tpu.pipeline_mode<synchronous>, transform_indices = @transform_2, window_bounds = array<i64: 1, 384>}, {transform_indices = @transform_3, window_bounds = array<i64: 1, 1, 256>}]} {
    %c0 = arith.constant 0 : index
    %c0_0 = arith.constant 0 : index
    %0 = vector.load %arg1[%c0, %c0_0] : memref<8x32xf32, #tpu.memory_space<vmem>>, vector<8x32xf32>
    %c0_1 = arith.constant 0 : index
    %c0_2 = arith.constant 0 : index
    %1 = vector.load %arg2[%c0_1, %c0_2] : memref<32x384xf32, #tpu.memory_space<vmem>>, vector<32x384xf32>
    %cst = arith.constant dense<0.000000e+00> : vector<8x384xf32>
    %2 = tpu.matmul %0, %1, %cst {dimension_numbers = #tpu.dot_dimension_numbers<[1], [0], [0], [1], [0, 0, 1, 1], [], []>} : vector<8x32xf32>, vector<32x384xf32>, vector<8x384xf32> -> vector<8x384xf32>
    %c0_3 = arith.constant 0 : index
    %c0_4 = arith.constant 0 : index
    %3 = vector.load %arg3[%c0_3, %c0_4] : memref<1x384xf32, #tpu.memory_space<vmem>>, vector<1x384xf32>
    %4 = vector.broadcast %3 : vector<1x384xf32> to vector<8x384xf32>
    %5 = arith.addf %2, %4 : vector<8x384xf32>
    %6 = vector.shape_cast %5 : vector<8x384xf32> to vector<1x8x384xf32>
    %7 = vector.extract_strided_slice %6 {offsets = [0, 0, 0], sizes = [1, 8, 128], strides = [1, 1, 1]} : vector<1x8x384xf32> to vector<1x8x128xf32>
    %8 = vector.extract_strided_slice %6 {offsets = [0, 0, 128], sizes = [1, 8, 128], strides = [1, 1, 1]} : vector<1x8x384xf32> to vector<1x8x128xf32>
    %9 = vector.extract_strided_slice %6 {offsets = [0, 0, 256], sizes = [1, 8, 128], strides = [1, 1, 1]} : vector<1x8x384xf32> to vector<1x8x128xf32>
    "tpu.trace_start"() <{level = 10 : i32, message = "bqe,bke->bqk"}> : () -> ()
    %cst_5 = arith.constant dense<0.000000e+00> : vector<1x8x8xf32>
    %10 = tpu.matmul %7, %8, %cst_5 {dimension_numbers = #tpu.dot_dimension_numbers<[2], [2], [1], [1], [0, 0, 0, 1, 1, 1], [0], [0]>} : vector<1x8x128xf32>, vector<1x8x128xf32>, vector<1x8x8xf32> -> vector<1x8x8xf32>
    "tpu.trace_stop"() : () -> ()
    %cst_6 = arith.constant dense<0xFF800000> : vector<1x8xf32>
    %11 = vector.multi_reduction <maximumf>, %10, %cst_6 [2] : vector<1x8x8xf32> to vector<1x8xf32>
    %12 = vector.shape_cast %11 : vector<1x8xf32> to vector<1x8x1xf32>
    %13 = vector.broadcast %12 : vector<1x8x1xf32> to vector<1x8x8xf32>
    %14 = arith.subf %10, %13 : vector<1x8x8xf32>
    %15 = math.exp %14 : vector<1x8x8xf32>
    %cst_7 = arith.constant dense<0.000000e+00> : vector<1x8xf32>
    %16 = vector.multi_reduction <add>, %15, %cst_7 [2] : vector<1x8x8xf32> to vector<1x8xf32>
    %17 = vector.shape_cast %16 : vector<1x8xf32> to vector<1x8x1xf32>
    %18 = tpu.reciprocal %17 {approx = true} : vector<1x8x1xf32> -> vector<1x8x1xf32>
    %19 = vector.broadcast %18 : vector<1x8x1xf32> to vector<1x8x8xf32>
    %20 = arith.mulf %15, %19 : vector<1x8x8xf32>
    "tpu.trace_start"() <{level = 10 : i32, message = "bqk,bke->bqe"}> : () -> ()
    %cst_8 = arith.constant dense<0.000000e+00> : vector<1x8x128xf32>
    %21 = tpu.matmul %20, %9, %cst_8 {dimension_numbers = #tpu.dot_dimension_numbers<[2], [1], [1], [2], [0, 0, 0, 1, 1, 2], [0], [0]>} : vector<1x8x8xf32>, vector<1x8x128xf32>, vector<1x8x128xf32> -> vector<1x8x128xf32>
    "tpu.trace_stop"() : () -> ()
    %22 = vector.extract_strided_slice %21 {offsets = [0, 0, 0], sizes = [1, 8, 32], strides = [1, 1, 1]} : vector<1x8x128xf32> to vector<1x8x32xf32>
    %23 = vector.shape_cast %22 : vector<1x8x32xf32> to vector<1x1x256xf32>
    %c0_9 = arith.constant 0 : index
    %c0_10 = arith.constant 0 : index
    %c0_11 = arith.constant 0 : index
    %24 = vector.load %arg4[%c0_9, %c0_10, %c0_11] : memref<1x1x256xf32, #tpu.memory_space<vmem>>, vector<1x1x256xf32>
    tpu.vector_store %arg4[%c0_9, %c0_10, %c0_11], %23 {strides = array<i32>} : memref<1x1x256xf32, #tpu.memory_space<vmem>>, vector<1x1x256xf32>,
    return
  }
  func.func @transform_0(%arg0: i32) -> (i32, i32) {
    %c0_i32 = arith.constant 0 : i32
    %c0_i32_0 = arith.constant 0 : i32
    return %arg0, %c0_i32 : i32, i32
  }
  func.func @transform_1(%arg0: i32) -> (i32, i32) {
    %c0_i32 = arith.constant 0 : i32
    %c0_i32_0 = arith.constant 0 : i32
    %c0_i32_1 = arith.constant 0 : i32
    return %c0_i32, %c0_i32_0 : i32, i32
  }
  func.func @transform_2(%arg0: i32) -> (i32, i32) {
    %c0_i32 = arith.constant 0 : i32
    %c0_i32_0 = arith.constant 0 : i32
    %c0_i32_1 = arith.constant 0 : i32
    return %c0_i32, %c0_i32_0 : i32, i32
  }
  func.func @transform_3(%arg0: i32) -> (i32, i32, i32) {
    %c0_i32 = arith.constant 0 : i32
    %c0_i32_0 = arith.constant 0 : i32
    %c0_i32_1 = arith.constant 0 : i32
    return %arg0, %c0_i32, %c0_i32_0 : i32, i32, i32
  }
}

</mosaic_0001>

<bundles_post_ra>
// kernel: tpu_custom_call.1
= control target key start
LH: loop header
LB: loop body
LE: loop exit
PB: predicated region body
PF: predicated region fallthrough
CT: control target
= control target key end

     0   :  { %8 = vsyncpa [#allocation3], 0  ;;  %s1262_s0 = inlined_call_operand.hbm [shape: f32[16,32], index: 0, kind: input, shape index: {}]   ;;  %s1263_s1 = inlined_call_operand.hbm [shape: f32[32,384], index: 1, kind: input, shape index: {}]   ;;  %s1264_s2 = inlined_call_operand.vmem [shape: f32[1,384], index: 2, kind: input, shape index: {}]   ;;  %s1265_s3 = inlined_call_operand.hbm [shape: f32[2,1,256], index: 3, kind: output, shape index: {}]  }
   0x1   :  { %10 = vsyncpa [#allocation3 + $0x1], 0 }
   0x2   :  { %11 = vsyncpa [#allocation6], 0 }
   0x3   :  { %12 = vsyncpa [#allocation4], 0 }
   0x4   :  { %14 = vsyncpa [#allocation4 + $0x1], 0  ;;  %s1029_s12 = smov 0   ;;  %s1031_s13 = smov 0  }
   0x5   :  { %s1033_s14 = smov 0   ;;  %s1035_s15 = smov 0  }
   0x6 LB: > { %s1050_s16 = sadd.s32 4294967295, %s993_s15   ;;  %s730_s17 = sadd.s32 4294967294, %s993_s15   ;;  %s993_s15 = sphi %s1035_s15, %s1285_s15   ;;  %s989_s14 = sphi %s1033_s14, %s1284_s14   ;;  %s985_s13 = sphi %s1031_s13, %s1283_s13   ;;  %s981_s12 = sphi %s1029_s12, %s1282_s12  }
   0x7   : > { %p40_p0 = scmp.ne.s32.totalorder %s985_s13, %s981_s12  ;;  %p1266_p1 = scmp.eq.s32.totalorder %s1050_s16, 0 }
   0x8   : > { %p112_p3 = scmp.eq.s32.totalorder %s730_s17, 1  ;;  %p731_p5 = scmp.ge.s32.totalorder %s993_s15, 1 }
   0x9   : > { %p1059_p4 = por %p1266_p1, %p40_p0  ;;  %p119_p7 = scmp.lt.s32.totalorder %s993_s15, 3 }
   0xa   : > { %p1064_p6 = por %p112_p3, %p40_p0  ;;  %s995_s21 = smov [#allocation5]  }
   0xb   : > { %s1269_s18 = scalar_select %p1059_p4, 1, 0 }
   0xc   : > { %s1270_s19 = scalar_select %p1064_p6, 1, 0 }
   0xd   : > { %p1069_p8 = pnand %p731_p5, %p119_p7  ;;  %s131_s22 = sshll.u32 %s995_s21, 4  ;;  %s1073_s22 = int_to_ptr.vmem [resolvable:$true] %s131_s22 }
   0xe   : > { %s1085_s24 = sadd.s32 1, %s993_s15   ;;  %s27_s25 = sadd.s32 1, %s989_s14 }
   0xf   : > { %s1271_s20 = scalar_select %p1069_p8, 1, 0 }
  0x10   : > { %p801_p9 = pneg %p1069_p8  ;;  %s24_s26 = ssub.s32 %s993_s15, %s1085_s24 }
  0x11   : > { %s865_s29 = scalar_lea.hbm %s1263_s1, 1536 }
  0x12   : > { %p1080_p11 = pnand %p801_p9, %p1266_p1  ;;  %p866_p12 = scmp.ne.s32.totalorder %s1263_s1, %s865_s29 }
  0x13   : > { %p872_p5 = scmp.lt.u32.totalorder %s865_s29, %s1263_s1 }
  0x14   : > { %p867_p13 = pneg %p1080_p11 }
  0x16   : > { %p868_p0 = pnand %p867_p13, %p866_p12 }
  0x18   : > { %p869_p3 = pneg %p868_p0 }
  0x1a   : > { %p874_p7 = pnand %p872_p5, %p869_p3 }
  0x1c   : > { %877 = shalt.err (!%p874_p7)
}
  0x1d   : > { %s878_s7 = scalar_lea.vmem %s1073_s22, 1536  ;;  %p886_p2 = scmp.lt.s32.totalorder %s1073_s22, %s1073_s22 }
  0x1e   : > { %p879_p9 = scmp.ne.s32.totalorder %s1073_s22, %s878_s7  ;;  %p887_p6 = scmp.lt.s32.totalorder %s878_s7, %s878_s7 }
  0x20   : > { %p881_p10 = pnand %p879_p9, %p867_p13  ;;  %p888_p4 = por %p887_p6, %p886_p2 }
  0x22   : > { %p882_p1 = pneg %p881_p10 }
  0x24   : > { %p889_p8 = pnand %p888_p4, %p882_p1 }
  0x26   : > { %892 = shalt.err (!%p889_p8)
}
  0x27   : > { %s996_s8 = smov 384   ;;  %s997_s9 = smov 24  }
  0x28   : > { %804 = dma.hbm_to_vmem [thread:$0]  (!%p1080_p11), %s1263_s1, 1536, %s1073_s22, [#allocation6], %s996_s8, %s996_s8, %s997_s9  }
  0x29   : > { %p25_p2 = scmp.eq.s32.totalorder %s24_s26, 0  ;;  %p34_p1 = scmp.ne.s32.totalorder %s989_s14, %s985_s13 }
  0x2a   : > { %p35_p4 = scmp.eq.s32.totalorder %s993_s15, 0  ;;  %p814_p6 = scmp.lt.s32.totalorder %s993_s15, 2 }
  0x2b   : > { %s1116_s17 = scalar_select %p25_p2, %s989_s14, %s27_s25  }
  0x2c   : > { %p36_p8 = por %p35_p4, %p34_p1  ;;  %p1273_p10 = scmp.eq.s32.totalorder %s1050_s16, 1 }
  0x2d   : > { %s148_s27 = sand.u32 1, %s989_s14   ;;  %s735_s28 = sshll.u32 %s993_s15, 7 }
  0x2e   : > { %p1120_p12 = por %p1273_p10, %p34_p1  ;;  %s734_s29 = sshll.u32 %s148_s27, 3 }
  0x2f   : > { %s1129_s4 = scalar_lea.hbm %s1262_s0, %s735_s28  ;;  %s152_s22 = scalar_lea.vmem [#allocation2], %s734_s29 }
  0x30   : > { %s159_s25 = sshll.u32 %s152_s22, 4  ;;  %p1131_p11 = pnand %p814_p6, %p36_p8  ;;  %s1135_s25 = int_to_ptr.vmem [resolvable:$true] %s159_s25 }
  0x31   : > { %s149_s5 = scalar_lea.sflag [#allocation3], %s148_s27  ;;  %s893_s6 = scalar_lea.hbm %s1129_s4, 128 }
  0x32   : > { %p894_p13 = scmp.ne.s32.totalorder %s1129_s4, %s893_s6  ;;  %p895_p0 = pneg %p1131_p11 }
  0x33   : > { %s898_s9 = scalar_lea.hbm %s1262_s0, 256  ;;  %p899_p7 = scmp.lt.u32.totalorder %s1129_s4, %s1262_s0 }
  0x34   : > { %p896_p3 = pnand %p895_p0, %p894_p13  ;;  %p900_p9 = scmp.lt.u32.totalorder %s898_s9, %s893_s6 }
  0x35   : > { %p902_p1 = scmp.lt.u32.totalorder %s893_s6, %s1129_s4 }
  0x36   : > { %p897_p5 = pneg %p896_p3  ;;  %p901_p2 = por %p900_p9, %p899_p7 }
  0x38   : > { %p903_p4 = por %p902_p1, %p901_p2 }
  0x3a   : > { %p904_p6 = pnand %p903_p4, %p897_p5 }
  0x3c   : > { %907 = shalt.err (!%p904_p6)
}
  0x3d   : > { %s908_s27 = scalar_lea.vmem %s1135_s25, 128  ;;  %s998_s28 = smov [#allocation2]  }
  0x3e   : > { %p909_p8 = scmp.ne.s32.totalorder %s1135_s25, %s908_s27  ;;  %s913_s29 = sshll.u32 %s998_s28, 4  ;;  %s914_s29 = int_to_ptr.vmem [resolvable:$false] %s913_s29 }
  0x3f   : > { %s915_s23 = scalar_lea.vmem %s914_s29, 256  ;;  %p916_p3 = scmp.lt.s32.totalorder %s1135_s25, %s914_s29 }
  0x40   : > { %p911_p10 = pnand %p909_p8, %p895_p0  ;;  %p917_p7 = scmp.lt.s32.totalorder %s915_s23, %s908_s27 }
  0x42   : > { %p912_p13 = pneg %p911_p10  ;;  %p918_p9 = por %p917_p7, %p916_p3 }
  0x44   : > { %p919_p2 = pnand %p918_p9, %p912_p13 }
  0x46   : > { %922 = shalt.err (!%p919_p2)
}
  0x47   : > { %808 = dma.hbm_to_vmem [thread:$0]  (!%p1131_p11), %s1129_s4, 128, %s1135_s25, %s149_s5  }
  0x48   : > { %p1276_p5 = scmp.ne.s32.totalorder %s1271_s20, 0 }
  0x49   : > { %s1165_s30 = sand.u32 (!%p1276_p5), 1, %s985_s13   ;;  %p1277_p0 = scmp.ne.s32.totalorder (!%p1276_p5), %s1269_s18, 0 }
  0x4a   : > { %168 = sbr.rel (%p1276_p5) target bundleno = 1210 (0x4ba), region = 32  ;;  %s737_s22 = sshll.u32 (!%p1276_p5), %s1165_s30, 3 }
  0x4b   : > { %s171_s6 = scalar_lea.sflag (!%p1276_p5), [#allocation3], %s1165_s30  ;;  %s174_s7 = scalar_lea.vmem (!%p1276_p5), [#allocation2], %s737_s22 }
  0x51   : > { %968 = dma.done.wait (%p1277_p0), %s171_s6, 128  }
  0x52   : > { %970 = vsyncadd (%p1277_p0), %s171_s6, 4294967168  ;;  %p1278_p1 = scmp.eq.s32.totalorder %s1050_s16, 0 }
  0x54   : > { %972 = dma.done.wait (%p1278_p1), [#allocation6], 1536   ;;  %p1279_p11 = pmov %p1278_p1 }
  0x55   : > { %v999_v0 = vmov 0.0   ;;  %v203_v1 = vld [vmem:[#allocation5 + $0x8] sm:$0xff]  ;;  %v206_v2 = vld [vmem:[#allocation5 + $0x20] sm:$0xff]  ;;  %v205_v5 = vld [vmem:[#allocation5 + $0x18] sm:$0xff]  ;;  %vm231_vm0 = vcmask 261120   ;;  %vm1000_vm1 = vmmov 0   ;;  %v216_v14 = vlaneseq }
  0x56   : > { %974 = vsyncadd (%p1279_p11), [#allocation6], 4294965760  ;;  %299 = vmatprep.mubr.f32.mxu0 %v999_v0  ;;  %v202_v3 = vld [vmem:[#allocation5] sm:$0xff]  ;;  %v779_v4 = vpack.c.bf16 %v206_v2, %v203_v1  ;;  %v209_v6 = vld [vmem:[#allocation5 + $0x38] sm:$0xff]  ;;  %766 = vmatprep.mubr.msk.f32.mxu1 %vm1000_vm1, %v999_v0  ;;  %v1001_v28 = vmov 0.0|0.0   ;;  %vm446_vm2 = vcmask 64512  }
  0x57   : > { %v212_v7 = vld [vmem:[#allocation5 + $0x50] sm:$0xff]  ;;  %v781_v8 = vpack.c.bf16 %v205_v5, %v202_v3  ;;  %v211_v11 = vld [vmem:[#allocation5 + $0x48] sm:$0xff]  ;;  %v1185_v15 = vshrl.u32 %v216_v14, 7  ;;  %v210_v27 = vld [vmem:[#allocation5 + $0x40] sm:$0xff]  ;;  %787 = vmatprep.subr.bf16.mxu1 %v1001_v28  ;;  %v1002_v48 = vmov 1983009808  }
  0x58   : > { %v783_v9 = vpack.c.bf16 %v212_v7, %v209_v6  ;;  %v208_v10 = vld [vmem:[#allocation5 + $0x30] sm:$0xff]  ;;  %780 = vmatprep.subr.bf16.mxu0 %v779_v4  ;;  %v207_v26 = vld [vmem:[#allocation5 + $0x28] sm:$0xff]  ;;  %v213_v30 = vld [vmem:[#allocation5 + $0x58] sm:$0xff]  ;;  %v533_v49 = vunpack.c.l.s4 %v1002_v48  ;;  %v1003_v50 = vmov 1934713408   ;;  %s1004_s4 = smov 32  }
  0x59   : > { %782 = vmatpush1.bf16.msra.mxu0 %v781_v8  ;;  %v785_v12 = vpack.c.bf16 %v211_v11, %v208_v10  ;;  %v201_v13 = vld [vmem:[%s174_s7] sm:$0xff]  ;;  %v222_v16 = vsub.s32 1, %v1185_v15  ;;  %v218_v18 = vsub.s32 0, %v1185_v15  ;;  %v791_v31 = vpack.c.bf16 %v213_v30, %v210_v27  ;;  %s1005_s25 = smov 64   ;;  %s1006_s26 = smov 96  }
  0x5a   : > { %784 = vmatprep.subr.bf16.mxu0 %v783_v9  ;;  %v214_v17 = vld [vmem:[%s1264_s2] sm:$0x7]  ;;  %v226_v40 = vsub.s32 2, %v1185_v15  ;;  %v548_v51 = vunpack.c.l.s4 %v1003_v50  ;;  %v534_v52 = vunpack.c.0.s8 %v533_v49  ;;  %v1007_v11 = vmov 1966171168   ;;  %s739_s5 = sshll.u32 %s1165_s30, 1 }
  0x5b   : > { %v223_v19 = vrot.slane %v214_v17, %v222_v16  ;;  %v219_v21 = vrot.slane %v214_v17, %v218_v18  ;;  %v204_v25 = vld [vmem:[#allocation5 + $0x10] sm:$0xff]  ;;  %vm605_vm3 = vcmask 523264   ;;  %vm607_vm4 = vcmask 785408   ;;  %s748_s8 = sshll.u32 %s1050_s16, 5  ;;  %s200_s9 = scalar_lea.vmem [#allocation7], %s739_s5 }
  0x5c   : > { %v788_v29 = vpack.c.bf16 %v207_v26, %v204_v25  ;;  %v227_v41 = vrot.slane %v214_v17, %v226_v40  ;;  %v549_v53 = vunpack.c.0.s8 %v548_v51  ;;  %v537_v54 = vsub.s32 %v534_v52, %v1185_v15  ;;  %s650_s10 = sshll.u32 %s200_s9, 4  ;;  %s1218_s28 = scalar_lea.hbm %s1265_s3, %s748_s8  ;;  %s1220_s10 = int_to_ptr.vmem [resolvable:$true] %s650_s10 }
  0x5d   : > { %786 = vmatpush1.bf16.msra.mxu0 %v785_v12  ;;  %v616_v12 = vunpack.c.l.s4 %v1007_v11  ;;  %vm632_vm5 = vcmp.lt.s32.totalorder %v216_v14, 256  ;;  %s636_s29 = scalar_lea.sflag [#allocation4], %s1165_s30  ;;  %s923_s23 = scalar_lea.vmem %s1220_s10, 32 }
  0x5e   : > { %769 = vmatprep.subr.mxu0 %v999_v0  ;;  %789 = vmatpush3.bf16.msra.mxu1 %v788_v29  ;;  %v552_v55 = vsub.s32 %v549_v53, %v1185_v15  ;;  %p924_p4 = scmp.ne.s32.totalorder %s1220_s10, %s923_s23  ;;  %s1008_s16 = smov [#allocation7]  }
  0x5f   : > { %790 = vmatprep.subr.bf16.mxu1 %v1001_v28  ;;  %v617_v16 = vunpack.c.0.s8 %v616_v12  ;;  %s927_s22 = sshll.u32 %s1008_s16, 4  ;;  %s928_s22 = int_to_ptr.vmem [resolvable:$false] %s927_s22 }
  0x60   : > { %740 = vmatmul.mubr.msk.f32.vlgmr.msra.gmra.mrb[0].mxu0 %vm231_vm0, %v201_v13  ;;  %p925_p6 = pnand %p924_p4, %p1120_p12  ;;  %s929_s6 = scalar_lea.vmem %s928_s22, 64 }
  0x61   : > { %771 = vmatprep.mubr.msk.f32.mxu0 %vm1000_vm1, %v999_v0  ;;  %p930_p10 = scmp.lt.s32.totalorder %s1220_s10, %s928_s22  ;;  %p931_p13 = scmp.lt.s32.totalorder %s929_s6, %s923_s23 }
  0x62   : > { %792 = vmatpush3.bf16.msra.mxu1 %v791_v31  ;;  %p926_p8 = pneg %p925_p6 }
  0x63   : > { %774 = vmatprep.subr.mxu1 %v999_v0  ;;  %p932_p3 = por %p931_p13, %p930_p10 }
  0x65   : > { %767 = vmatmul.mubr.msk.f32.vlgmr.msra.gmra.mrb[0].mxu1 %vm231_vm0, %v201_v13  ;;  %p933_p7 = pnand %p932_p3, %p926_p8 }
  0x66   : > { %776 = vmatprep.mubr.msk.f32.mxu1 %vm1000_vm1, %v999_v0 }
 0x133   : > { %v301_v20 = vpop.f32.mrb[0].mxu0 }
 0x134   : > { %v303_v22 = vpop.f32.mrb[1].mxu0  ;;  %v302_v24 = vadd.f32 %v301_v20, %v219_v21  ;;  %v620_v21 = vsub.s32 %v617_v16, %v1185_v15 }
 0x135   : > { %v304_v23 = vadd.f32 %v303_v22, %v223_v19 }
 0x137   : > { %770 = vmatpush3.xpose.msra.mxu0 %v304_v23 }
 0x138   : > { %v372_v42 = vpop.f32.mrb[0].mxu1 }
 0x139   : > { %v768_v43 = vpop.f32.mrb[1].mxu1  ;;  %v373_v44 = vadd.f32 %v372_v42, %v227_v41 }
 0x13a   : > { %772 = vmatmul.mubr.f32.vlgmr.msra.gmra.mrb[2].mxu0 %v302_v24 }
 0x13b   : > { %775 = vmatpush3.msra.mxu1 %v373_v44 }
 0x20d   : > { %v442_v32 = vpop.f32.mrb[2].mxu0 }
 0x20e   : > { %v773_v33 = vpop.f32.mrb[3].mxu0  ;;  %v447_v34 = vsel %vm446_vm2, %v442_v32, -inf }
 0x20f   : > { %448 = vmax.xlane.f32.xlu0 %v447_v34 }
 0x29c   : > { %v449_v35 = vpop.xlane.xlu0 %448 }
 0x29d   : > { %v450_v36 = vsub.f32 %v442_v32, %v449_v35 }
 0x29f   : > { %v451_v37 = vmul.f32 1.442695, %v450_v36 }
 0x2a1   : > { %861 = vpow2.f32 %v451_v37 }
 0x2ab   : > { %v862_v38 = vpop.eup %861 }
 0x2ac   : > { %v453_v39 = vsel %vm446_vm2, %v862_v38, 0.0 }
 0x2ad   : > { %454 = vadd.xlane.f32.xlu0 %v453_v39 }
 0x33a   : > { %v455_v45 = vpop.xlane.xlu0 %454 }
 0x33b   : > { %863 = vrcp.f32 %v455_v45 }
 0x345   : > { %v864_v46 = vpop.eup %863 }
 0x346   : > { %v457_v47 = vmul.f32 %v864_v46, %v862_v38 }
 0x348   : > { %777 = vmatmul.mubr.msk.f32.vlgmr.msra.gmra.mrb[2].mxu1 %vm446_vm2, %v457_v47 }
 0x41b   : > { %v527_v56 = vpop.f32.mrb[2].mxu1 }
 0x41c   : > { %v531_v57 = vcombine.high %v527_v56, %v999_v0  ;;  %v538_v58 = vrot.slane %v527_v56, %v537_v54  ;;  %v778_v59 = vpop.f32.mrb[3].mxu1 }
 0x41e   : > { %v545_v60 = vrot.slane %v531_v57, %v537_v54  ;;  %v546_v61 = vcombine.high %v538_v58, %v999_v0  ;;  %v553_v62 = vrot.slane %v538_v58, %v552_v55 }
 0x420   : > { %v568_v63 = vrot.slane %v545_v60, %v552_v55  ;;  %v576_v1 = vcombine.high %v553_v62, %v999_v0  ;;  %v560_v2 = vrot.slane %v546_v61, %v552_v55  ;;  %v561_v3 = vcombine.high %v545_v60, %v999_v0 }
 0x422   : > { %581 = vrot.lane.b32.xlu1 %v576_v1, %s1004_s4  ;;  %585 = vrot.lane.b32.xlu0 %v560_v2, %s1005_s25  ;;  %v578_v4 = vcombine.high %v568_v63, %v999_v0  ;;  %v575_v5 = vrot.slane %v561_v3, %v552_v55  ;;  %v577_v6 = vcombine.high %v560_v2, %v999_v0 }
 0x424   : > { %v579_v7 = vcombine.high %v575_v5, %v999_v0 }
 0x426   : > { %593 = vrot.lane.b32.xlu1 %v578_v4, %s1004_s4 }
 0x42a   : > { %597 = vrot.lane.b32.xlu1 %v575_v5, %s1005_s25 }
 0x42e   : > { %589 = vrot.lane.b32.xlu1 %v577_v6, %s1006_s26 }
 0x432   : > { %601 = vrot.lane.b32.xlu1 %v579_v7, %s1006_s26 }
 0x494   : > { %v582_v8 = vpop.permute.xlu1 %581  ;;  %v586_v18 = vpop.permute.xlu0 %585 }
 0x495   : > { %v604_v17 = vsel %vm231_vm0, %v553_v62, %v582_v8 }
 0x496   : > { %v606_v20 = vsel %vm605_vm3, %v604_v17, %v586_v18 }
 0x498   : > { %v594_v9 = vpop.permute.xlu1 %593 }
 0x499   : > { %v609_v19 = vsel %vm231_vm0, %v568_v63, %v594_v9 }
 0x49c   : > { %v598_v10 = vpop.permute.xlu1 %597 }
 0x49d   : > { %v610_v0 = vsel %vm605_vm3, %v609_v19, %v598_v10 }
 0x4a0   : > { %v590_v13 = vpop.permute.xlu1 %589 }
 0x4a1   : > { %v608_v23 = vsel %vm607_vm4, %v606_v20, %v590_v13 }
 0x4a4   : > { %v602_v22 = vpop.permute.xlu1 %601 }
 0x4a5   : > { %v611_v24 = vsel %vm607_vm4, %v610_v0, %v602_v22 }
 0x4a6   : > { %v614_v25 = vcombine.low %v608_v23, %v611_v24 }
 0x4a8   : > { %v621_v26 = vrot.slane %v614_v25, %v620_v21 }
 0x4aa   : > { %v628_v27 = vrot.slane %v621_v26, %v620_v21 }
 0x4ac   : > { %634 = vst.msk [vmem:[%s200_s9] sm:$0x3] %vm632_vm5, %v628_v27 }
 0x4ad   : > { %936 = shalt.err (!%p933_p7)
}
 0x4ae   : > { %s937_s30 = scalar_lea.hbm %s1218_s28, 32  ;;  %s941_s20 = scalar_lea.hbm %s1265_s3, 64 }
 0x4af   : > { %p938_p9 = scmp.ne.s32.totalorder %s1218_s28, %s937_s30  ;;  %p942_p0 = scmp.lt.u32.totalorder %s1218_s28, %s1265_s3 }
 0x4b0   : > { %p943_p1 = scmp.lt.u32.totalorder %s941_s20, %s937_s30  ;;  %p945_p4 = scmp.lt.u32.totalorder %s937_s30, %s1218_s28 }
 0x4b1   : > { %p939_p2 = pnand %p938_p9, %p1120_p12 }
 0x4b2   : > { %p944_p11 = por %p943_p1, %p942_p0 }
 0x4b3   : > { %p940_p5 = pneg %p939_p2 }
 0x4b4   : > { %p946_p6 = por %p945_p4, %p944_p11 }
 0x4b6   : > { %p947_p8 = pnand %p946_p6, %p940_p5 }
 0x4b8   : > { %950 = shalt.err (!%p947_p8)
}
 0x4b9   : > { %799 = dma.vmem_to_hbm [thread:$0]  (%p1120_p12), %s1220_s10, 32, %s1218_s28, %s636_s29  }
 0x4ba PF: > { %s662_s26 = sand.u32 1, %s981_s12   ;;  %p1280_p10 = scmp.ne.s32.totalorder %s1270_s19, 0 }
 0x4bb   : > { %p1281_p13 = scmp.ge.s32.totalorder %s993_s15, 2  ;;  %s663_s5 = scalar_lea.sflag [#allocation4], %s662_s26 }
 0x4bd   : > { %p810_p3 = pnand %p1281_p13, %p1280_p10 }
 0x4bf   : > { %976 = dma.done.wait (!%p810_p3), %s663_s5, 32  }
 0x4c0   : > { %978 = vsyncadd (!%p810_p3), %s663_s5, 4294967264  ;;  %p17_p7 = scmp.ge.s32.totalorder %s1085_s24, 4   ;;  %s1282_s12 = smov %s985_s13 }
 0x4c1   : > { %s1283_s13 = smov %s989_s14  ;;  %s1284_s14 = smov %s1116_s17 }
 0x4c2   : > { %s1285_s15 = smov %s1085_s24  ;;  %19 = sbr.rel (!%p17_p7) target bundleno = 6 (0x6), region = 81 }
 0x4c9   :  { %668 = vsyncpa [#allocation3], 1 }
 0x4ca   :  { %670 = vsyncpa [#allocation3 + $0x1], 1 }
 0x4cb   :  { %671 = vsyncpa [#allocation6], 1 }
 0x4cc   :  { %672 = vsyncpa [#allocation4], 1 }
 0x4cd   :  { %674 = vsyncpa [#allocation4 + $0x1], 1 }

</bundles_post_ra>
